<compile_context>
chip_gen: v7x
topology: tpu7x:2x2x1
jax: 0.10.0
libtpu: 0.0.40
codegen_flags: <defaults>
</compile_context>

<pallas_src>
import functools
from math import sqrt

import jax
import jax.numpy as jnp
from jax import lax
from jax.experimental import pallas as pl
from jax.experimental.pallas import tpu as pltpu

_LANE = 128      # lane width: pad feature dims to a multiple of this
_SUBLANE = 8     # f32 sublane width: pad the batch dim to a multiple of this


def _round_up(n, m):
    return ((n + m - 1) // m) * m


# --------------------------------------------------------------------------
# Kernel: fused forward pass of the whole MLP on one batch tile.
# --------------------------------------------------------------------------
def _fused_mlp_kernel(x_ref, w_ref, b_ref, o_ref, *, n_layers):
    """
      x_ref : (TILE_B, D_p)        lane-padded activations for this batch tile
      w_ref : (L, D_p, D_p)        stacked, pre-transposed, zero-padded weights
      b_ref : (L, 1, D_p)          stacked, zero-padded biases
      o_ref : (TILE_B, D_p)
    Activations stay in vregs/VMEM for the whole network; only the final tile
    is stored (lane-dense, 128-wide).
    """
    h = x_ref[...]
    for li in range(n_layers):                     # static Python loop -> fully unrolled
        w = w_ref[li]                              # static slice of the stacked weights (free)
        b = b_ref[li]                              # (1, D_p), broadcasts over the batch rows
        h = jnp.dot(h, w,
                    preferred_element_type=jnp.float32,
                    precision=lax.Precision.HIGHEST) + b
        if li < n_layers - 1:
            h = jnp.maximum(h, 0.0)                # fused ReLU on all but the last layer
    o_ref[...] = h.astype(o_ref.dtype)


def _fused_mlp_call(x_p, w_all, b_all, *, n_layers, tile_b):
    """One pallas_call for the entire network, tiled over the batch axis.

    Weight/bias index_maps are constant -> they are DMA'd once and stay
    VMEM-resident across all grid steps.  The batch axis is "parallel" so the
    two TensorCores on v7x split the tiles (harmless no-op on v5e/v6e).
    """
    batch_p, d_p = x_p.shape
    grid = (batch_p // tile_b,)
    kernel = functools.partial(_fused_mlp_kernel, n_layers=n_layers)
    return pl.pallas_call(
        kernel,
        out_shape=jax.ShapeDtypeStruct((batch_p, d_p), x_p.dtype),
        grid_spec=pltpu.PrefetchScalarGridSpec(
            num_scalar_prefetch=0,
            grid=grid,
            in_specs=[
                pl.BlockSpec((tile_b, d_p), lambda i: (i, 0)),
                pl.BlockSpec((n_layers, d_p, d_p), lambda i: (0, 0, 0)),
                pl.BlockSpec((n_layers, 1, d_p), lambda i: (0, 0, 0)),
            ],
            out_specs=pl.BlockSpec((tile_b, d_p), lambda i: (i, 0)),
        ),
        compiler_params=pltpu.CompilerParams(
            dimension_semantics=("parallel",)),
    )(x_p, w_all, b_all)


# --------------------------------------------------------------------------
# Host-side parameter handling.
# --------------------------------------------------------------------------
def init_dense_lookahead_params(key, n_neurons, dtype=jnp.float32):
    """PyTorch-Linear-style init: U(-1/sqrt(fan_in), 1/sqrt(fan_in)).
    Weights stored PyTorch-style as [out_features, in_features]."""
    params = []
    for i in range(len(n_neurons) - 1):
        fan_in, fan_out = n_neurons[i], n_neurons[i + 1]
        key, kw, kb = jax.random.split(key, 3)
        bound = 1.0 / sqrt(fan_in)
        w = jax.random.uniform(kw, (fan_out, fan_in), dtype=dtype,
                               minval=-bound, maxval=bound)
        b = jax.random.uniform(kb, (fan_out,), dtype=dtype,
                               minval=-bound, maxval=bound)
        params.append((w, b))
    return params


def prepare_params_for_kernel(params):
    """One-time host-side prep: transpose every weight to [in, out], zero-pad
    every feature dim up to the common lane-padded width D_p, and stack all
    layers into ONE weight tensor (L, D_p, D_p) and ONE bias tensor (L, 1, D_p).

    Zero padding is mathematically exact: padded input columns hit zero weight
    rows, padded hidden lanes get zero bias, stay zero through ReLU and feed
    the next layer's zero weight rows; padded output lanes are sliced off."""
    dims = [params[0][0].shape[1]] + [w.shape[0] for w, _ in params]
    d_p = max(_round_up(d, _LANE) for d in dims)
    n_layers = len(params)
    dtype = params[0][0].dtype
    w_all = jnp.zeros((n_layers, d_p, d_p), dtype)
    b_all = jnp.zeros((n_layers, 1, d_p), dtype)
    for li, (w, b) in enumerate(params):
        out_f, in_f = w.shape
        w_all = w_all.at[li, :in_f, :out_f].set(w.T)
        b_all = b_all.at[li, 0, :out_f].set(b)
    return w_all, b_all, dims


def make_dense_lookahead_forward(params, max_tile_b=512):
    """Builds a jitted forward fn (matches DenseLookAheadNetwork.forward:
    ReLU after every layer except the last).  Pad, kernel and output slice all
    live inside one jitted executable."""
    w_all, b_all, dims = prepare_params_for_kernel(params)
    in_f, out_f = dims[0], dims[-1]
    n_layers = len(params)
    d_p = w_all.shape[-1]

    @jax.jit
    def forward(x):
        batch = x.shape[0]
        tile_b = _round_up(batch, _SUBLANE)
        if tile_b > max_tile_b:
            tile_b = max_tile_b
        batch_p = _round_up(batch, tile_b)
        x_p = jnp.zeros((batch_p, d_p), x.dtype).at[:batch, :in_f].set(x)
        y_p = _fused_mlp_call(x_p, w_all, b_all,
                              n_layers=n_layers, tile_b=tile_b)
        return y_p[:batch, :out_f]

    return forward


# --------------------------------------------------------------------------
# Plain-JAX reference (mirrors the PyTorch module's math).
# --------------------------------------------------------------------------
def _reference_forward(x, params):
    n_layers = len(params)
    for li, (w, b) in enumerate(params):
        x = jnp.dot(x, w.T, precision=lax.Precision.HIGHEST) + b
        if li < n_layers - 1:
            x = jnp.maximum(x, 0.0)
    return x


if __name__ == "__main__":
    key = jax.random.PRNGKey(0)
    k_in, k_params, k_big = jax.random.split(key, 3)

    n_neurons = [32, 64, 64, 8]   # input 32, two hidden layers of 64, output 8
    batch = 8

    params = init_dense_lookahead_params(k_params, n_neurons, dtype=jnp.float32)

    # Small-batch path (grid degenerates to a single tile).
    forward = make_dense_lookahead_forward(params)
    x = jax.random.normal(k_in, (batch, n_neurons[0]), dtype=jnp.float32)
    out = jax.block_until_ready(forward(x))
    ref = _reference_forward(x, params)
    assert out.shape == (batch, n_neurons[-1])
    assert jnp.allclose(out, ref, atol=1e-5, rtol=1e-5)

    # Batched / multi-tile path: exercises grid>(1,) with the "parallel" axis
    # and VMEM-resident weights across grid steps.
    forward_tiled = make_dense_lookahead_forward(params, max_tile_b=128)
    x_big = jax.random.normal(k_big, (300, n_neurons[0]), dtype=jnp.float32)
    out_big = jax.block_until_ready(forward_tiled(x_big))
    ref_big = _reference_forward(x_big, params)
    assert out_big.shape == (300, n_neurons[-1])
    assert jnp.allclose(out_big, ref_big, atol=1e-5, rtol=1e-5)

    print("KERNEL_OK")
</pallas_src>

<mosaic_0001>
module attributes {stable_mosaic.version = 11 : i64} {
  func.func @_fused_mlp_kernel(%arg0: i32, %arg1: memref<8x128xf32, #tpu.memory_space<vmem>>, %arg2: memref<3x128x128xf32, #tpu.memory_space<vmem>>, %arg3: memref<3x1x128xf32, #tpu.memory_space<vmem>>, %arg4: memref<8x128xf32, #tpu.memory_space<vmem>>) attributes {dimension_semantics = [#tpu.dimension_semantics<parallel>], iteration_bounds = array<i64: 1>, scalar_prefetch = 0 : i64, scratch_operands = 0 : i64, tpu.core_type = #tpu.core_type<tc>, window_params = [{transform_indices = @transform_0, window_bounds = array<i64: 8, 128>}, {pipeline_mode = #tpu.pipeline_mode<synchronous>, transform_indices = @transform_1, window_bounds = array<i64: 3, 128, 128>}, {pipeline_mode = #tpu.pipeline_mode<synchronous>, transform_indices = @transform_2, window_bounds = array<i64: 3, 1, 128>}, {transform_indices = @transform_3, window_bounds = array<i64: 8, 128>}]} {
    %c0 = arith.constant 0 : index
    %c0_0 = arith.constant 0 : index
    %0 = vector.load %arg1[%c0, %c0_0] : memref<8x128xf32, #tpu.memory_space<vmem>>, vector<8x128xf32>
    %c0_1 = arith.constant 0 : index
    %c0_2 = arith.constant 0 : index
    %c0_3 = arith.constant 0 : index
    %1 = vector.load %arg2[%c0_1, %c0_2, %c0_3] : memref<3x128x128xf32, #tpu.memory_space<vmem>>, vector<1x128x128xf32>
    %2 = vector.shape_cast %1 : vector<1x128x128xf32> to vector<128x128xf32>
    %c0_4 = arith.constant 0 : index
    %c0_5 = arith.constant 0 : index
    %c0_6 = arith.constant 0 : index
    %3 = vector.load %arg3[%c0_4, %c0_5, %c0_6] : memref<3x1x128xf32, #tpu.memory_space<vmem>>, vector<1x1x128xf32>
    %4 = vector.shape_cast %3 : vector<1x1x128xf32> to vector<1x128xf32>
    %cst = arith.constant dense<0.000000e+00> : vector<8x128xf32>
    %5 = tpu.matmul %0, %2, %cst {dimension_numbers = #tpu.dot_dimension_numbers<[1], [0], [0], [1], [0, 0, 1, 1], [], []>, precision = #tpu.contract_precision<fp32>} : vector<8x128xf32>, vector<128x128xf32>, vector<8x128xf32> -> vector<8x128xf32>
    %6 = vector.broadcast %4 : vector<1x128xf32> to vector<8x128xf32>
    %7 = arith.addf %5, %6 : vector<8x128xf32>
    %cst_7 = arith.constant 0.000000e+00 : f32
    %8 = vector.broadcast %cst_7 : f32 to vector<8x128xf32>
    %9 = arith.maximumf %7, %8 : vector<8x128xf32>
    %c1 = arith.constant 1 : index
    %c0_8 = arith.constant 0 : index
    %c0_9 = arith.constant 0 : index
    %10 = vector.load %arg2[%c1, %c0_8, %c0_9] : memref<3x128x128xf32, #tpu.memory_space<vmem>>, vector<1x128x128xf32>
    %11 = vector.shape_cast %10 : vector<1x128x128xf32> to vector<128x128xf32>
    %c1_10 = arith.constant 1 : index
    %c0_11 = arith.constant 0 : index
    %c0_12 = arith.constant 0 : index
    %12 = vector.load %arg3[%c1_10, %c0_11, %c0_12] : memref<3x1x128xf32, #tpu.memory_space<vmem>>, vector<1x1x128xf32>
    %13 = vector.shape_cast %12 : vector<1x1x128xf32> to vector<1x128xf32>
    %cst_13 = arith.constant dense<0.000000e+00> : vector<8x128xf32>
    %14 = tpu.matmul %9, %11, %cst_13 {dimension_numbers = #tpu.dot_dimension_numbers<[1], [0], [0], [1], [0, 0, 1, 1], [], []>, precision = #tpu.contract_precision<fp32>} : vector<8x128xf32>, vector<128x128xf32>, vector<8x128xf32> -> vector<8x128xf32>
    %15 = vector.broadcast %13 : vector<1x128xf32> to vector<8x128xf32>
    %16 = arith.addf %14, %15 : vector<8x128xf32>
    %cst_14 = arith.constant 0.000000e+00 : f32
    %17 = vector.broadcast %cst_14 : f32 to vector<8x128xf32>
    %18 = arith.maximumf %16, %17 : vector<8x128xf32>
    %c2 = arith.constant 2 : index
    %c0_15 = arith.constant 0 : index
    %c0_16 = arith.constant 0 : index
    %19 = vector.load %arg2[%c2, %c0_15, %c0_16] : memref<3x128x128xf32, #tpu.memory_space<vmem>>, vector<1x128x128xf32>
    %20 = vector.shape_cast %19 : vector<1x128x128xf32> to vector<128x128xf32>
    %c2_17 = arith.constant 2 : index
    %c0_18 = arith.constant 0 : index
    %c0_19 = arith.constant 0 : index
    %21 = vector.load %arg3[%c2_17, %c0_18, %c0_19] : memref<3x1x128xf32, #tpu.memory_space<vmem>>, vector<1x1x128xf32>
    %22 = vector.shape_cast %21 : vector<1x1x128xf32> to vector<1x128xf32>
    %cst_20 = arith.constant dense<0.000000e+00> : vector<8x128xf32>
    %23 = tpu.matmul %18, %20, %cst_20 {dimension_numbers = #tpu.dot_dimension_numbers<[1], [0], [0], [1], [0, 0, 1, 1], [], []>, precision = #tpu.contract_precision<fp32>} : vector<8x128xf32>, vector<128x128xf32>, vector<8x128xf32> -> vector<8x128xf32>
    %24 = vector.broadcast %22 : vector<1x128xf32> to vector<8x128xf32>
    %25 = arith.addf %23, %24 : vector<8x128xf32>
    %c0_21 = arith.constant 0 : index
    %c0_22 = arith.constant 0 : index
    %26 = vector.load %arg4[%c0_21, %c0_22] : memref<8x128xf32, #tpu.memory_space<vmem>>, vector<8x128xf32>
    tpu.vector_store %arg4[%c0_21, %c0_22], %25 {strides = array<i32>} : memref<8x128xf32, #tpu.memory_space<vmem>>, vector<8x128xf32>,
    return
  }
  func.func @transform_0(%arg0: i32) -> (i32, i32) {
    %c0_i32 = arith.constant 0 : i32
    %c0_i32_0 = arith.constant 0 : i32
    return %arg0, %c0_i32 : i32, i32
  }
  func.func @transform_1(%arg0: i32) -> (i32, i32, i32) {
    %c0_i32 = arith.constant 0 : i32
    %c0_i32_0 = arith.constant 0 : i32
    %c0_i32_1 = arith.constant 0 : i32
    %c0_i32_2 = arith.constant 0 : i32
    return %c0_i32, %c0_i32_0, %c0_i32_1 : i32, i32, i32
  }
  func.func @transform_2(%arg0: i32) -> (i32, i32, i32) {
    %c0_i32 = arith.constant 0 : i32
    %c0_i32_0 = arith.constant 0 : i32
    %c0_i32_1 = arith.constant 0 : i32
    %c0_i32_2 = arith.constant 0 : i32
    return %c0_i32, %c0_i32_0, %c0_i32_1 : i32, i32, i32
  }
  func.func @transform_3(%arg0: i32) -> (i32, i32) {
    %c0_i32 = arith.constant 0 : i32
    %c0_i32_0 = arith.constant 0 : i32
    return %arg0, %c0_i32 : i32, i32
  }
}

</mosaic_0001>

<bundles_post_ra>
// kernel: forward.1
= control target key start
LH: loop header
LB: loop body
LE: loop exit
PB: predicated region body
PF: predicated region fallthrough
CT: control target
= control target key end

     0   :  { %8 = vsyncpa [#allocation3], 0  ;;  %s4440_s0 = inlined_call_operand.vmem [shape: f32[8,128], index: 0, kind: input, shape index: {}]   ;;  %s4441_s1 = inlined_call_operand.hbm [shape: f32[3,128,128], index: 1, kind: input, shape index: {}]   ;;  %s4442_s2 = inlined_call_operand.vmem [shape: f32[3,1,128], index: 2, kind: input, shape index: {}]   ;;  %s4443_s3 = inlined_call_operand.hbm [shape: f32[8,128], index: 3, kind: output, shape index: {}]  }
   0x1   :  { %9 = vsyncpa [#allocation4], 0  ;;  %s3504_s12 = smov [#allocation2]   ;;  %s3456_s16 = scalar_lea.hbm %s4441_s1, 6144 }
   0x2   :  { %s17_s13 = sshll.u32 %s3504_s12, 4  ;;  %p3457_p0 = scmp.ne.s32.totalorder %s4441_s1, %s3456_s16  ;;  %s18_s13 = int_to_ptr.vmem [resolvable:$true] %s17_s13 }
   0x3   :  { %p3460_p1 = scmp.lt.u32.totalorder %s3456_s16, %s4441_s1 }
   0x5   :  { %p3462_p2 = pnand %p3460_p1, %p3457_p0 }
   0x7   :  { %3465 = shalt.err (!%p3462_p2)
}
   0x8   :  { %s3466_s21 = scalar_lea.vmem %s18_s13, 6144  ;;  %p3471_p4 = scmp.lt.s32.totalorder %s18_s13, %s18_s13 }
   0x9   :  { %p3467_p3 = scmp.ne.s32.totalorder %s18_s13, %s3466_s21  ;;  %p3472_p5 = scmp.lt.s32.totalorder %s3466_s21, %s3466_s21 }
   0xb   :  { %p3473_p6 = por %p3472_p5, %p3471_p4 }
   0xd   :  { %p3474_p7 = pnand %p3473_p6, %p3467_p3 }
   0xf   :  { %3477 = shalt.err (!%p3474_p7)
}
  0x10   :  { %s3505_s22 = smov 128   ;;  %s3506_s23 = smov 8  }
  0x11   :  { %23 = dma.hbm_to_vmem [thread:$0]  %s4441_s1, 6144, %s18_s13, [#allocation3], %s3505_s22, %s3505_s22, %s3506_s23  }
  0x12   :  { %3500 = dma.done.wait [#allocation3], 6144  }
  0x13   :  { %3501 = vsyncadd [#allocation3], 4294961152  ;;  %v4460_v0 = vmov 0.0|0.0   ;;  %vm3508_vm0 = vmmov 0   ;;  %v4454_v1 = vmov 0.0   ;;  %v30_v2 = vld [vmem:[#allocation2] sm:$0xff] }
  0x14   :  { %2985 = vmatprep.subr.bf16.mxu1 %v4460_v0  ;;  %3057 = vmatprep.subr.bf16.mxu0 %v4460_v0  ;;  %v31_v3 = vld [vmem:[#allocation2 + $0x8] sm:$0xff]  ;;  %v32_v4 = vld [vmem:[#allocation2 + $0x10] sm:$0xff]  ;;  %v54_v5 = vand.u32 4294901760, %v30_v2  ;;  %v33_v7 = vld [vmem:[#allocation2 + $0x18] sm:$0xff]  ;;  %s3510_s5 = smov [#allocation5]  }
  0x15   :  { %2387 = vmatprep.mubr.msk.f32.mxu1 %vm3508_vm0, %v4454_v1  ;;  %2492 = vmatprep.mubr.msk.f32.mxu0 %vm3508_vm0, %v4454_v1  ;;  %v57_v6 = vand.u32 4294901760, %v31_v3  ;;  %v60_v8 = vand.u32 4294901760, %v32_v4  ;;  %v63_v9 = vand.u32 4294901760, %v33_v7  ;;  %v34_v10 = vld [vmem:[#allocation2 + $0x20] sm:$0xff]  ;;  %v35_v11 = vld [vmem:[#allocation2 + $0x28] sm:$0xff]  ;;  %v3557_v16 = vld [vmem:[#allocation2 + $0x30] sm:$0xff] }
  0x16   :  { %v66_v14 = vand.u32 4294901760, %v34_v10  ;;  %v69_v15 = vand.u32 4294901760, %v35_v11  ;;  %v3559_v17 = vld [vmem:[#allocation2 + $0x38] sm:$0xff]  ;;  %v72_v19 = vand.u32 4294901760, %v3557_v16  ;;  %v38_v21 = vld [vmem:[#allocation2 + $0x40] sm:$0xff]  ;;  %v39_v22 = vld [vmem:[#allocation2 + $0x48] sm:$0xff]  ;;  %v3580_v27 = vsub.f32 %v30_v2, %v54_v5 }
  0x17   :  { %v3549_v12 = vpack.c.bf16 %v57_v6, %v54_v5  ;;  %v3553_v13 = vpack.c.bf16 %v63_v9, %v60_v8  ;;  %v75_v20 = vand.u32 4294901760, %v3559_v17  ;;  %v78_v24 = vand.u32 4294901760, %v38_v21  ;;  %v29_v26 = vld [vmem:[%s4440_s0] sm:$0xff]  ;;  %v3586_v29 = vld [vmem:[#allocation2 + $0x50] sm:$0xff]  ;;  %v3588_v30 = vld [vmem:[#allocation2 + $0x58] sm:$0xff]  ;;  %s2035_s6 = sshll.u32 %s3510_s5, 4  ;;  %s2036_s6 = int_to_ptr.vmem [resolvable:$true] %s2035_s6 }
  0x18   :  { %v3563_v18 = vpack.c.bf16 %v69_v15, %v66_v14  ;;  %v81_v25 = vand.u32 4294901760, %v39_v22  ;;  %v3582_v28 = vsub.f32 %v31_v3, %v57_v6  ;;  %v3590_v31 = vand.u32 4294901760, %v29_v26  ;;  %v3604_v37 = vld [vmem:[#allocation2 + $0x60] sm:$0xff]  ;;  %v3606_v38 = vld [vmem:[#allocation2 + $0x68] sm:$0xff]  ;;  %v3625_v46 = vld [vmem:[#allocation2 + $0x70] sm:$0xff]  ;;  %s3478_s7 = scalar_lea.vmem %s2036_s6, 128  ;;  %p3483_p9 = scmp.lt.s32.totalorder %s2036_s6, %s2036_s6 }
  0x19   :  { %2987 = vmatpush3.bf16.msra.mxu1 %v3549_v12  ;;  %3059 = vmatpush3.bf16.msra.mxu0 %v3549_v12  ;;  %v3575_v23 = vpack.c.bf16 %v75_v20, %v72_v19  ;;  %v3592_v32 = vsub.f32 %v32_v4, %v60_v8  ;;  %v84_v34 = vand.u32 4294901760, %v3586_v29  ;;  %v87_v35 = vand.u32 4294901760, %v3588_v30  ;;  %v3627_v47 = vld [vmem:[#allocation2 + $0x78] sm:$0xff]  ;;  %v3658_v63 = vld [vmem:[#allocation2 + $0x80] sm:$0xff]  ;;  %v3670_v4 = vld [vmem:[#allocation2 + $0x88] sm:$0xff]  ;;  %p3479_p8 = scmp.ne.s32.totalorder %s2036_s6, %s3478_s7  ;;  %p3484_p10 = scmp.lt.s32.totalorder %s3478_s7, %s3478_s7 }
  0x1a   :  { %2988 = vmatprep.subr.bf16.mxu1 %v4460_v0  ;;  %3060 = vmatprep.subr.bf16.mxu0 %v4460_v0  ;;  %v3596_v33 = vpack.c.bf16 %v81_v25, %v78_v24  ;;  %v3600_v36 = vsub.f32 %v33_v7, %v63_v9  ;;  %v147_v39 = vand.u32 4294901760, %v3580_v27  ;;  %v154_v40 = vand.u32 4294901760, %v3582_v28  ;;  %v3683_v9 = vld [vmem:[#allocation2 + $0x90] sm:$0xff] }
  0x1b   :  { %v3610_v41 = vsub.f32 %v34_v10, %v66_v14  ;;  %v3613_v42 = vsub.f32 %v29_v26, %v3590_v31  ;;  %v3621_v43 = vpack.c.bf16 %v87_v35, %v84_v34  ;;  %v90_v44 = vand.u32 4294901760, %v3604_v37  ;;  %v3685_v10 = vld [vmem:[#allocation2 + $0x98] sm:$0xff]  ;;  %p3485_p11 = por %p3484_p10, %p3483_p9 }
  0x1c   :  { %v4456_v45 = vand.u32 4294901760, %v3606_v38  ;;  %v161_v48 = vand.u32 4294901760, %v3592_v32  ;;  %v3630_v49 = vsub.f32 %v35_v11, %v69_v15  ;;  %v148_v50 = vsub.f32 %v3580_v27, %v147_v39 }
  0x1d   :  { %2990 = vmatpush3.bf16.msra.mxu1 %v3553_v13  ;;  %3062 = vmatpush3.bf16.msra.mxu0 %v3553_v13  ;;  %v155_v51 = vsub.f32 %v3582_v28, %v154_v40  ;;  %v168_v52 = vand.u32 4294901760, %v3600_v36  ;;  %v4447_v53 = vand.u32 4294901760, %v3625_v46  ;;  %v4445_v54 = vand.u32 4294901760, %v3627_v47  ;;  %p3486_p12 = pnand %p3485_p11, %p3479_p8 }
  0x1e   :  { %2991 = vmatprep.subr.bf16.mxu1 %v4460_v0  ;;  %3063 = vmatprep.subr.bf16.mxu0 %v4460_v0  ;;  %v136_v55 = vand.u32 4294901760, %v3613_v42  ;;  %v3646_v56 = vpack.c.bf16 %v4456_v45, %v90_v44  ;;  %v3651_v57 = vsub.f32 %v3592_v32, %v161_v48  ;;  %v4451_v58 = vand.u32 4294901760, %v3610_v41 }
  0x1f   :  { %v149_v59 = vand.u32 4294901760, %v148_v50  ;;  %v156_v60 = vand.u32 4294901760, %v155_v51  ;;  %v169_v61 = vsub.f32 %v3600_v36, %v168_v52  ;;  %v4449_v62 = vand.u32 4294901760, %v3630_v49  ;;  %v3714_v51 = vld [vmem:[#allocation2 + $0xb8] sm:$0xff] }
  0x20   :  { %v3663_v2 = vsub.f32 %v3557_v16, %v72_v19  ;;  %v3668_v3 = vsub.f32 %v3559_v17, %v75_v20  ;;  %v3672_v5 = vsub.f32 %v38_v21, %v78_v24  ;;  %v3674_v6 = vsub.f32 %v39_v22, %v81_v25  ;;  %v3694_v17 = vld [vmem:[#allocation2 + $0xa0] sm:$0xff]  ;;  %v3696_v19 = vld [vmem:[#allocation2 + $0xa8] sm:$0xff]  ;;  %v3704_v25 = vld [vmem:[#allocation2 + $0xb0] sm:$0xff] }
  0x21   :  { %2993 = vmatpush3.bf16.msra.mxu1 %v3563_v18  ;;  %3065 = vmatpush3.bf16.msra.mxu0 %v3563_v18  ;;  %v3680_v7 = vpack.c.bf16 %v4445_v54, %v4447_v53  ;;  %v137_v8 = vsub.f32 %v3613_v42, %v136_v55  ;;  %v3082_v11 = vpack.c.bf16 %v154_v40, %v147_v39  ;;  %v163_v14 = vand.u32 4294901760, %v3651_v57 }
  0x22   :  { %2994 = vmatprep.subr.bf16.mxu1 %v4460_v0  ;;  %3066 = vmatprep.subr.bf16.mxu0 %v4460_v0  ;;  %v176_v15 = vsub.f32 %v3610_v41, %v4451_v58  ;;  %v4444_v16 = vand.u32 4294901760, %v3658_v63  ;;  %v3010_v20 = vpack.c.bf16 %v156_v60, %v149_v59  ;;  %v170_v21 = vand.u32 4294901760, %v169_v61 }
  0x23   :  { %v183_v22 = vsub.f32 %v3630_v49, %v4449_v62  ;;  %v4446_v24 = vand.u32 4294901760, %v3670_v4  ;;  %v189_v26 = vand.u32 4294901760, %v3663_v2  ;;  %v4448_v40 = vand.u32 4294901760, %v3683_v9 }
  0x24   :  { %v3710_v39 = vsub.f32 %v3658_v63, %v4444_v16  ;;  %v4450_v50 = vand.u32 4294901760, %v3685_v10  ;;  %v138_v57 = vand.u32 4294901760, %v137_v8  ;;  %v4452_v60 = vand.u32 4294901760, %v3694_v17 }
  0x25   :  { %2996 = vmatpush3.bf16.msra.mxu1 %v3575_v23  ;;  %3068 = vmatpush3.bf16.msra.mxu0 %v3575_v23  ;;  %v3719_v59 = vsub.f32 %v3670_v4, %v4446_v24  ;;  %v4453_v61 = vand.u32 4294901760, %v3696_v19  ;;  %v196_v16 = vand.u32 4294901760, %v3668_v3  ;;  %v3729_v54 = vsub.f32 %v3683_v9, %v4448_v40 }
  0x26   :  { %2997 = vmatprep.subr.bf16.mxu1 %v4460_v0  ;;  %3069 = vmatprep.subr.bf16.mxu0 %v4460_v0  ;;  %v3734_v8 = vsub.f32 %v3685_v10, %v4450_v50  ;;  %v4458_v24 = vand.u32 4294901760, %v3704_v25  ;;  %v3742_v53 = vsub.f32 %v3694_v17, %v4452_v60  ;;  %v4457_v62 = vand.u32 4294901760, %v3714_v51 }
  0x27   :  { %v3747_v40 = vsub.f32 %v3696_v19, %v4453_v61  ;;  %v3753_v50 = vsub.f32 %v3586_v29, %v84_v34  ;;  %v3758_v58 = vsub.f32 %v3588_v30, %v87_v35  ;;  %v3085_v60 = vpack.c.bf16 %v168_v52, %v161_v48 }
  0x28   :  { %v3765_v61 = vsub.f32 %v3704_v25, %v4458_v24  ;;  %v177_v1 = vand.u32 4294901760, %v176_v15  ;;  %v184_v45 = vand.u32 4294901760, %v183_v22  ;;  %v203_v29 = vand.u32 4294901760, %v3672_v5 }
  0x29   :  { %2999 = vmatpush3.bf16.msra.mxu1 %v3596_v33  ;;  %3071 = vmatpush3.bf16.msra.mxu0 %v3596_v33  ;;  %v3771_v34 = vsub.f32 %v3714_v51, %v4457_v62  ;;  %v3013_v30 = vpack.c.bf16 %v170_v21, %v163_v14  ;;  %v190_v35 = vsub.f32 %v3663_v2, %v189_v26  ;;  %v210_v52 = vand.u32 4294901760, %v3674_v6 }
  0x2a   :  { %3000 = vmatprep.subr.bf16.mxu1 %v4460_v0  ;;  %3072 = vmatprep.subr.bf16.mxu0 %v4460_v0  ;;  %4479 = vst [vmem:[#allocation8_spill] sm:$0xff] %v3765_v61  ;;  %v197_v48 = vsub.f32 %v3668_v3, %v196_v16  ;;  %v4481_v15 = vand.u32 4294901760, %v3606_v38  ;;  %v4482_v14 = vmov 0.0   ;;  %v4483_v21 = vand.u32 4294901760, %v3610_v41 }
  0x2b   :  { %4480 = vst [vmem:[#allocation9_spill] sm:$0xff] %v3771_v34  ;;  %v4484_v22 = vand.u32 4294901760, %v3630_v49  ;;  %v211_v62 = vsub.f32 %v3674_v6, %v210_v52  ;;  %v224_v24 = vand.u32 4294901760, %v3758_v58 }
  0x2d   :  { %3002 = vmatpush3.bf16.msra.mxu1 %v3621_v43  ;;  %3074 = vmatpush3.bf16.msra.mxu0 %v3621_v43  ;;  %v225_v61 = vsub.f32 %v3758_v58, %v224_v24 }
  0x2e   :  { %3003 = vmatprep.subr.bf16.mxu1 %v4460_v0  ;;  %3075 = vmatprep.subr.bf16.mxu0 %v4460_v0 }
  0x31   :  { %3005 = vmatpush3.bf16.msra.mxu1 %v3646_v56  ;;  %3077 = vmatpush3.bf16.msra.mxu0 %v3646_v56 }
  0x32   :  { %3006 = vmatprep.subr.bf16.mxu1 %v4460_v0  ;;  %3078 = vmatprep.subr.bf16.mxu0 %v4460_v0 }
  0x35   :  { %3008 = vmatpush3.bf16.msra.mxu1 %v3680_v7  ;;  %3080 = vmatpush3.bf16.msra.mxu0 %v3680_v7 }
  0x36   :  { %3009 = vmatprep.subr.bf16.mxu1 %v4460_v0  ;;  %3081 = vmatprep.subr.bf16.mxu0 %v4460_v0 }
  0x38   :  { %2388 = vmatmul.mubr.f32.vlgmr.msra.gmra.mrb[0].mxu1 %v138_v57  ;;  %2493 = vmatmul.mubr.f32.vlgmr.msra.gmra.mrb[0].mxu0 %v136_v55  ;;  %v3781_v55 = vsub.f32 %v3604_v37, %v90_v44  ;;  %v3088_v57 = vpack.c.bf16 %v4484_v22, %v4483_v21  ;;  %v204_v37 = vsub.f32 %v3672_v5, %v203_v29  ;;  %v217_v44 = vand.u32 4294901760, %v3753_v50 }
  0x39   :  { %3011 = vmatpush3.bf16.msra.mxu1 %v3010_v20  ;;  %3083 = vmatpush3.bf16.msra.mxu0 %v3082_v11  ;;  %v3786_v11 = vsub.f32 %v3606_v38, %v4481_v15  ;;  %v3016_v20 = vpack.c.bf16 %v184_v45, %v177_v1  ;;  %v191_v38 = vand.u32 4294901760, %v190_v35  ;;  %v198_v15 = vand.u32 4294901760, %v197_v48 }
  0x3a   :  { %3012 = vmatprep.subr.bf16.mxu1 %v4460_v0  ;;  %3084 = vmatprep.subr.bf16.mxu0 %v4460_v0  ;;  %v4485_v1 = vand.u32 4294901760, %v3625_v46  ;;  %v4486_v21 = vand.u32 4294901760, %v3627_v47  ;;  %v205_v35 = vand.u32 4294901760, %v204_v37  ;;  %v218_v48 = vsub.f32 %v3753_v50, %v217_v44 }
  0x3b   :  { %2422 = vmatprep.mubr.msk.f32.mxu1 %vm3508_vm0, %v4482_v14  ;;  %2527 = vmatprep.mubr.msk.f32.mxu0 %vm3508_vm0, %v4482_v14  ;;  %v231_v22 = vand.u32 4294901760, %v3781_v55  ;;  %v3019_v34 = vpack.c.bf16 %v198_v15, %v191_v38  ;;  %v3097_v38 = vpack.c.bf16 %v224_v24, %v217_v44 }
  0x3c   :  { %v3805_v45 = vsub.f32 %v3625_v46, %v4485_v1  ;;  %v238_v46 = vand.u32 4294901760, %v3786_v11  ;;  %v4487_v1 = vmov 0.0|0.0  }
  0x3d   :  { %3014 = vmatpush3.bf16.msra.mxu1 %v3013_v30  ;;  %3086 = vmatpush3.bf16.msra.mxu0 %v3085_v60  ;;  %v3810_v30 = vsub.f32 %v3627_v47, %v4486_v21  ;;  %v3091_v60 = vpack.c.bf16 %v196_v16, %v189_v26  ;;  %v3094_v47 = vpack.c.bf16 %v210_v52, %v203_v29  ;;  %v219_v21 = vand.u32 4294901760, %v218_v48 }
  0x3e   :  { %3015 = vmatprep.subr.bf16.mxu1 %v4460_v0  ;;  %3087 = vmatprep.subr.bf16.mxu0 %v4460_v0  ;;  %v212_v0 = vand.u32 4294901760, %v211_v62  ;;  %v232_v16 = vsub.f32 %v3781_v55, %v231_v22  ;;  %v245_v26 = vand.u32 4294901760, %v3805_v45  ;;  %v239_v62 = vsub.f32 %v3786_v11, %v238_v46 }
  0x3f   :  { %v252_v37 = vand.u32 4294901760, %v3810_v30 }
  0x40   :  { %v233_v15 = vand.u32 4294901760, %v232_v16  ;;  %v240_v52 = vand.u32 4294901760, %v239_v62  ;;  %v246_v48 = vsub.f32 %v3805_v45, %v245_v26 }
  0x41   :  { %3017 = vmatpush3.bf16.msra.mxu1 %v3016_v20  ;;  %3089 = vmatpush3.bf16.msra.mxu0 %v3088_v57  ;;  %v3022_v20 = vpack.c.bf16 %v212_v0, %v205_v35  ;;  %v226_v57 = vand.u32 4294901760, %v225_v61  ;;  %v3100_v61 = vpack.c.bf16 %v238_v46, %v231_v22  ;;  %v3103_v44 = vpack.c.bf16 %v252_v37, %v245_v26  ;;  %v711_v46 = vld [vmem:[#allocation2 + $0xf8] sm:$0xff] }
  0x42   :  { %3018 = vmatprep.subr.bf16.mxu1 %v4487_v1  ;;  %3090 = vmatprep.subr.bf16.mxu0 %v4487_v1  ;;  %v3028_v0 = vpack.c.bf16 %v240_v52, %v233_v15  ;;  %v3037_v22 = vpack.c.bf16 %v3600_v36, %v3592_v32  ;;  %v4488_v32 = vand.u32 4294901760, %v3658_v63  ;;  %v4495_v63 = vand.u32 4294901760, %v3714_v51  ;;  %v709_v51 = vld [vmem:[#allocation2 + $0xe8] sm:$0xff] }
  0x43   :  { %v3025_v29 = vpack.c.bf16 %v226_v57, %v219_v21  ;;  %v766_v16 = vand.u32 4294901760, %v711_v46  ;;  %v814_v26 = vand.u32 4294901760, %v3710_v39 }
  0x45   :  { %3020 = vmatpush3.bf16.msra.mxu1 %v3019_v34  ;;  %3092 = vmatpush3.bf16.msra.mxu0 %v3091_v60  ;;  %v253_v34 = vsub.f32 %v3810_v30, %v252_v37  ;;  %v247_v60 = vand.u32 4294901760, %v246_v48  ;;  %v815_v62 = vsub.f32 %v3710_v39, %v814_v26 }
  0x46   :  { %3021 = vmatprep.subr.bf16.mxu1 %v4487_v1  ;;  %3093 = vmatprep.subr.bf16.mxu0 %v4487_v1 }
  0x47   :  { %v254_v35 = vand.u32 4294901760, %v253_v34 }
  0x49   :  { %3023 = vmatpush3.bf16.msra.mxu1 %v3022_v20  ;;  %3095 = vmatpush3.bf16.msra.mxu0 %v3094_v47  ;;  %v3031_v24 = vpack.c.bf16 %v254_v35, %v247_v60  ;;  %v3034_v47 = vpack.c.bf16 %v3582_v28, %v3580_v27  ;;  %v3040_v27 = vpack.c.bf16 %v3630_v49, %v3610_v41  ;;  %v4490_v41 = vand.u32 4294901760, %v3683_v9  ;;  %v706_v9 = vld [vmem:[#allocation2 + $0xd0] sm:$0xff] }
  0x4a   :  { %3024 = vmatprep.subr.bf16.mxu1 %v4487_v1  ;;  %3096 = vmatprep.subr.bf16.mxu0 %v4487_v1  ;;  %v3055_v28 = vpack.c.bf16 %v3810_v30, %v3805_v45  ;;  %v710_v30 = vld [vmem:[#allocation2 + $0xf0] sm:$0xff]  ;;  %v821_v20 = vand.u32 4294901760, %v3719_v59  ;;  %v816_v60 = vand.u32 4294901760, %v815_v62 }
  0x4b   :  { %v763_v21 = vand.u32 4294901760, %v710_v30 }
  0x4c   :  { %v822_v37 = vsub.f32 %v3719_v59, %v821_v20 }
  0x4d   :  { %3026 = vmatpush3.bf16.msra.mxu1 %v3025_v29  ;;  %3098 = vmatpush3.bf16.msra.mxu0 %v3097_v38  ;;  %v3932_v57 = vpack.c.bf16 %v766_v16, %v763_v21 }
  0x4e   :  { %3027 = vmatprep.subr.bf16.mxu1 %v4487_v1  ;;  %3099 = vmatprep.subr.bf16.mxu0 %v4487_v1  ;;  %v823_v35 = vand.u32 4294901760, %v822_v37 }
  0x51   :  { %3029 = vmatpush3.bf16.msra.mxu1 %v3028_v0  ;;  %3101 = vmatpush3.bf16.msra.mxu0 %v3100_v61  ;;  %v3953_v0 = vsub.f32 %v710_v30, %v763_v21  ;;  %v3955_v61 = vsub.f32 %v711_v46, %v766_v16 }
  0x52   :  { %3030 = vmatprep.subr.bf16.mxu1 %v4487_v1  ;;  %3102 = vmatprep.subr.bf16.mxu0 %v4487_v1 }
  0x55   :  { %3032 = vmatpush3.bf16.msra.mxu1 %v3031_v24  ;;  %3104 = vmatpush3.bf16.msra.mxu0 %v3103_v44  ;;  %v828_v24 = vand.u32 4294901760, %v3729_v54  ;;  %v835_v44 = vand.u32 4294901760, %v3734_v8 }
  0x56   :  { %3033 = vmatprep.subr.bf16.mxu1 %v4487_v1  ;;  %3105 = vmatprep.subr.bf16.mxu0 %v4487_v1 }
  0x58   :  { %2423 = vmatmul.mubr.f32.vlgmr.msra.gmra.mrb[0].mxu1 %v3590_v31  ;;  %2528 = vmatmul.mubr.f32.vlgmr.msra.gmra.mrb[0].mxu0 %v3590_v31 }
  0x59   :  { %3035 = vmatpush3.bf16.msra.mxu1 %v3034_v47  ;;  %3107 = vmatpush3.bf16.msra.mxu0 %v3549_v12  ;;  %v3043_v12 = vpack.c.bf16 %v3668_v3, %v3663_v2  ;;  %v704_v3 = vld [vmem:[#allocation2 + $0xc0] sm:$0xff]  ;;  %v3960_v47 = vpack.c.bf16 %v823_v35, %v816_v60 }
  0x5a   :  { %3036 = vmatprep.subr.bf16.mxu1 %v4487_v1  ;;  %3108 = vmatprep.subr.bf16.mxu0 %v4487_v1 }
  0x5b   :  { %2457 = vmatprep.mubr.msk.f32.mxu1 %vm3508_vm0, %v4482_v14  ;;  %2562 = vmatprep.mubr.msk.f32.mxu0 %vm3508_vm0, %v4482_v14 }
  0x5d   :  { %3038 = vmatpush3.bf16.msra.mxu1 %v3037_v22  ;;  %3110 = vmatpush3.bf16.msra.mxu0 %v3553_v13  ;;  %v3046_v13 = vpack.c.bf16 %v3674_v6, %v3672_v5  ;;  %v745_v5 = vand.u32 4294901760, %v704_v3  ;;  %v829_v22 = vsub.f32 %v3729_v54, %v828_v24 }
  0x5e   :  { %3039 = vmatprep.subr.bf16.mxu1 %v4487_v1  ;;  %3111 = vmatprep.subr.bf16.mxu0 %v4487_v1 }
  0x5f   :  { %v3940_v38 = vsub.f32 %v704_v3, %v745_v5 }
  0x61   :  { %3041 = vmatpush3.bf16.msra.mxu1 %v3040_v27  ;;  %3113 = vmatpush3.bf16.msra.mxu0 %v3563_v18  ;;  %v3049_v18 = vpack.c.bf16 %v3758_v58, %v3753_v50  ;;  %v4494_v58 = vand.u32 4294901760, %v3704_v25  ;;  %v708_v50 = vld [vmem:[#allocation2 + $0xe0] sm:$0xff]  ;;  %v836_v27 = vsub.f32 %v3734_v8, %v835_v44 }
  0x62   :  { %3042 = vmatprep.subr.bf16.mxu1 %v4487_v1  ;;  %3114 = vmatprep.subr.bf16.mxu0 %v4487_v1 }
  0x63   :  { %v3913_v2 = vpack.c.bf16 %v4495_v63, %v4494_v58  ;;  %v4497_v58 = vld [vmem:[#allocation9_spill] sm:$0xff] }
  0x64   :  { %v4471_v63 = vand.u32 4294901760, %v4497_v58 }
  0x65   :  { %3044 = vmatpush3.bf16.msra.mxu1 %v3043_v12  ;;  %3116 = vmatpush3.bf16.msra.mxu0 %v3575_v23  ;;  %v3052_v23 = vpack.c.bf16 %v3786_v11, %v3781_v55  ;;  %v757_v55 = vand.u32 4294901760, %v708_v50  ;;  %v760_v11 = vand.u32 4294901760, %v709_v51  ;;  %v4474_v12 = vand.u32 4294901760, %v3742_v53 }
  0x66   :  { %3045 = vmatprep.subr.bf16.mxu1 %v4487_v1  ;;  %3117 = vmatprep.subr.bf16.mxu0 %v4487_v1 }
  0x67   :  { %v3926_v45 = vpack.c.bf16 %v760_v11, %v757_v55  ;;  %v3949_v48 = vsub.f32 %v708_v50, %v757_v55  ;;  %v3951_v34 = vsub.f32 %v709_v51, %v760_v11 }
  0x69   :  { %3047 = vmatpush3.bf16.msra.mxu1 %v3046_v13  ;;  %3119 = vmatpush3.bf16.msra.mxu0 %v3596_v33  ;;  %v4489_v33 = vand.u32 4294901760, %v3670_v4  ;;  %v705_v4 = vld [vmem:[#allocation2 + $0xc8] sm:$0xff]  ;;  %v4473_v13 = vand.u32 4294901760, %v3747_v40  ;;  %v4466_v35 = vand.u32 4294901760, %v3949_v48 }
  0x6a   :  { %3048 = vmatprep.subr.bf16.mxu1 %v4487_v1  ;;  %3120 = vmatprep.subr.bf16.mxu0 %v4487_v1  ;;  %v748_v6 = vand.u32 4294901760, %v705_v4 }
  0x6b   :  { %v3882_v36 = vpack.c.bf16 %v4489_v33, %v4488_v32  ;;  %v850_v32 = vsub.f32 %v3747_v40, %v4473_v13 }
  0x6c   :  { %v3942_v15 = vsub.f32 %v705_v4, %v748_v6 }
  0x6d   :  { %3050 = vmatpush3.bf16.msra.mxu1 %v3049_v18  ;;  %3122 = vmatpush3.bf16.msra.mxu0 %v3621_v43  ;;  %v4491_v43 = vand.u32 4294901760, %v3685_v10  ;;  %v707_v10 = vld [vmem:[#allocation2 + $0xd8] sm:$0xff]  ;;  %v830_v18 = vand.u32 4294901760, %v829_v22  ;;  %v4465_v22 = vand.u32 4294901760, %v3951_v34 }
  0x6e   :  { %3051 = vmatprep.subr.bf16.mxu1 %v4487_v1  ;;  %3123 = vmatprep.subr.bf16.mxu0 %v4487_v1 }
  0x6f   :  { %v3893_v49 = vpack.c.bf16 %v4491_v43, %v4490_v41  ;;  %v851_v43 = vand.u32 4294901760, %v850_v32 }
  0x71   :  { %3053 = vmatpush3.bf16.msra.mxu1 %v3052_v23  ;;  %3125 = vmatpush3.bf16.msra.mxu0 %v3646_v56  ;;  %v837_v23 = vand.u32 4294901760, %v836_v27 }
  0x72   :  { %3054 = vmatprep.subr.bf16.mxu1 %v4487_v1  ;;  %3126 = vmatprep.subr.bf16.mxu0 %v4487_v1 }
  0x73   :  { %v3976_v33 = vpack.c.bf16 %v837_v23, %v830_v18  ;;  %v899_v18 = vsub.f32 %v3949_v48, %v4466_v35  ;;  %v906_v23 = vsub.f32 %v3951_v34, %v4465_v22 }
  0x75   :  { %3056 = vmatpush3.bf16.msra.mxu1 %v3055_v28  ;;  %3128 = vmatpush3.bf16.msra.mxu0 %v3680_v7  ;;  %v3918_v7 = vpack.c.bf16 %v748_v6, %v745_v5  ;;  %v843_v28 = vsub.f32 %v3742_v53, %v4474_v12  ;;  %v864_v5 = vsub.f32 %v4497_v58, %v4471_v63  ;;  %v907_v32 = vand.u32 4294901760, %v906_v23 }
  0x76   :  { %3129 = vmatprep.subr.bf16.mxu1 %v4487_v1  ;;  %3273 = vmatprep.subr.bf16.mxu0 %v4487_v1  ;;  %v3199_v23 = vpack.c.bf16 %v3955_v61, %v3953_v0 }
  0x77   :  { %v844_v41 = vand.u32 4294901760, %v843_v28  ;;  %v900_v28 = vand.u32 4294901760, %v899_v18  ;;  %v3196_v18 = vpack.c.bf16 %v3951_v34, %v3949_v48 }
  0x78   :  { %2458 = vmatmul.mubr.f32.vlgmr.msra.gmra.mrb[0].mxu1 %v3613_v42  ;;  %2563 = vmatmul.mubr.f32.vlgmr.msra.gmra.mrb[0].mxu0 %v3590_v31  ;;  %v4492_v31 = vand.u32 4294901760, %v3694_v17  ;;  %v4493_v42 = vand.u32 4294901760, %v3696_v19  ;;  %v751_v17 = vand.u32 4294901760, %v706_v9  ;;  %v754_v19 = vand.u32 4294901760, %v707_v10 }
  0x79   :  { %3131 = vmatpush3.bf16.msra.mxu1 %v3882_v36  ;;  %2597 = vmatprep.mubr.msk.f32.mxu1 %vm3508_vm0, %v4482_v14  ;;  %v3160_v3 = vpack.c.bf16 %v851_v43, %v844_v41  ;;  %v4464_v41 = vand.u32 4294901760, %v3953_v0  ;;  %v4463_v43 = vand.u32 4294901760, %v3955_v61 }
  0x7a   :  { %3132 = vmatprep.subr.bf16.mxu1 %v4487_v1  ;;  %2807 = vmatprep.mubr.msk.f32.mxu0 %vm3508_vm0, %v4482_v14  ;;  %v3905_v56 = vpack.c.bf16 %v4493_v42, %v4492_v31  ;;  %v3922_v25 = vpack.c.bf16 %v754_v19, %v751_v17  ;;  %v3944_v29 = vsub.f32 %v706_v9, %v751_v17  ;;  %v4496_v31 = vld [vmem:[#allocation8_spill] sm:$0xff]  ;;  %v865_v9 = vand.u32 4294901760, %v864_v5 }
  0x7b   :  { %v3946_v52 = vsub.f32 %v707_v10, %v754_v19  ;;  %v4472_v42 = vand.u32 4294901760, %v4496_v31  ;;  %v4470_v10 = vand.u32 4294901760, %v3940_v38  ;;  %v4469_v17 = vand.u32 4294901760, %v3942_v15 }
  0x7c   :  { %v4468_v30 = vand.u32 4294901760, %v3944_v29  ;;  %v913_v5 = vsub.f32 %v3953_v0, %v4464_v41 }
  0x7d   :  { %3134 = vmatpush3.bf16.msra.mxu1 %v3893_v49  ;;  %v857_v4 = vsub.f32 %v4496_v31, %v4472_v42  ;;  %v871_v50 = vsub.f32 %v3940_v38, %v4470_v10  ;;  %v878_v51 = vsub.f32 %v3942_v15, %v4469_v17  ;;  %v4467_v46 = vand.u32 4294901760, %v3946_v52  ;;  %v1372_v10 = vld [vmem:[#allocation2 + $0x148] sm:$0xff] }
  0x7e   :  { %3135 = vmatprep.subr.bf16.mxu1 %v4487_v1  ;;  %v885_v16 = vsub.f32 %v3944_v29, %v4468_v30 }
  0x7f   :  { %v858_v6 = vand.u32 4294901760, %v857_v4  ;;  %v872_v55 = vand.u32 4294901760, %v871_v50  ;;  %v879_v11 = vand.u32 4294901760, %v878_v51  ;;  %v892_v62 = vsub.f32 %v3946_v52, %v4467_v46 }
  0x80   :  { %v886_v37 = vand.u32 4294901760, %v885_v16  ;;  %v3172_v4 = vpack.c.bf16 %v907_v32, %v900_v28  ;;  %v3184_v16 = vpack.c.bf16 %v3747_v40, %v3742_v53  ;;  %v2044_v28 = vld [vmem:[%s4442_s2] ss:$0 sm:$0xff] }
  0x81   :  { %3137 = vmatpush3.bf16.msra.mxu1 %v3905_v56  ;;  %v3163_v19 = vpack.c.bf16 %v865_v9, %v858_v6  ;;  %v3166_v21 = vpack.c.bf16 %v879_v11, %v872_v55  ;;  %v893_v60 = vand.u32 4294901760, %v892_v62  ;;  %v920_v6 = vsub.f32 %v3955_v61, %v4463_v43 }
  0x82   :  { %3138 = vmatprep.subr.bf16.mxu1 %v4487_v1  ;;  %v914_v9 = vand.u32 4294901760, %v913_v5  ;;  %v3178_v55 = vpack.c.bf16 %v3719_v59, %v3710_v39  ;;  %v3181_v11 = vpack.c.bf16 %v3734_v8, %v3729_v54  ;;  %v3187_v62 = vpack.c.bf16 %v4497_v58, %v4496_v31 }
  0x83   :  { %v3169_v27 = vpack.c.bf16 %v893_v60, %v886_v37  ;;  %v921_v50 = vand.u32 4294901760, %v920_v6  ;;  %v3190_v37 = vpack.c.bf16 %v3942_v15, %v3940_v38  ;;  %v3193_v60 = vpack.c.bf16 %v3946_v52, %v3944_v29 }
  0x84   :  { %v4498_v39 = vand.u32 4294901760, %v3742_v53  ;;  %v4499_v59 = vand.u32 4294901760, %v3747_v40  ;;  %v4501_v54 = vand.u32 4294901760, %v4497_v58  ;;  %v4504_v53 = vand.u32 4294901760, %v3944_v29 }
  0x85   :  { %3140 = vmatpush3.bf16.msra.mxu1 %v3913_v2  ;;  %v3175_v51 = vpack.c.bf16 %v921_v50, %v914_v9  ;;  %v4505_v40 = vand.u32 4294901760, %v3946_v52  ;;  %v4507_v58 = vand.u32 4294901760, %v3951_v34  ;;  %v1376_v52 = vld [vmem:[#allocation2 + $0x168] sm:$0xff]  ;;  %v1377_v34 = vld [vmem:[#allocation2 + $0x170] sm:$0xff] }
  0x86   :  { %3141 = vmatprep.subr.bf16.mxu1 %v4487_v1 }
  0x89   :  { %3143 = vmatpush3.bf16.msra.mxu1 %v3918_v7 }
  0x8a   :  { %3144 = vmatprep.subr.bf16.mxu1 %v4487_v1 }
  0x8d   :  { %3146 = vmatpush3.bf16.msra.mxu1 %v3922_v25 }
  0x8e   :  { %3147 = vmatprep.subr.bf16.mxu1 %v4487_v1 }
  0x91   :  { %3149 = vmatpush3.bf16.msra.mxu1 %v3926_v45 }
  0x92   :  { %3150 = vmatprep.subr.bf16.mxu1 %v4487_v1 }
  0x95   :  { %3152 = vmatpush3.bf16.msra.mxu1 %v3932_v57 }
  0x96   :  { %3153 = vmatprep.subr.bf16.mxu1 %v4487_v1 }
 0x14b   :  { %v395_v32 = vpop.f32.mrb[0].mxu1  ;;  %v690_v5 = vpop.f32.mrb[0].mxu0 }
 0x14c   :  { %v3417_v6 = vadd.f32 %v2044_v28, %v395_v32  ;;  %v2459_v9 = vpop.f32.mrb[1].mxu1  ;;  %v2564_v50 = vpop.f32.mrb[1].mxu0  ;;  %v1369_v28 = vld [vmem:[#allocation2 + $0x130] sm:$0xff]  ;;  %v1370_v32 = vld [vmem:[#allocation2 + $0x138] sm:$0xff] }
 0x14e   :  { %v3418_v43 = vadd.f32 %v3417_v6, %v690_v5  ;;  %v1371_v5 = vld [vmem:[#allocation2 + $0x140] sm:$0xff] }
 0x150   :  { %v694_v41 = vmax.f32 %v3418_v43, 0.0 }
 0x152   :  { %v4037_v22 = vand.u32 4294901760, %v694_v41 }
 0x154   :  { %v4040_v35 = vsub.f32 %v694_v41, %v4037_v22  ;;  %v1368_v41 = vld [vmem:[#allocation2 + $0x128] sm:$0xff] }
 0x156   :  { %v803_v46 = vand.u32 4294901760, %v4040_v35 }
 0x158   :  { %v804_v30 = vsub.f32 %v4040_v35, %v803_v46 }
 0x15a   :  { %v805_v17 = vand.u32 4294901760, %v804_v30  ;;  %v1366_v30 = vld [vmem:[#allocation2 + $0x118] sm:$0xff] }
 0x15b   :  { %v1397_v43 = vand.u32 4294901760, %v1366_v30 }
 0x15c   :  { %2598 = vmatmul.mubr.f32.vlgmr.msra.gmra.mrb[2].mxu1 %v805_v17 }
 0x15d   :  { %3155 = vmatpush3.bf16.msra.mxu1 %v3960_v47  ;;  %2632 = vmatprep.mubr.msk.f32.mxu1 %vm3508_vm0, %v4482_v14  ;;  %v1363_v47 = vld [vmem:[#allocation2 + $0x100] sm:$0xff]  ;;  %v4072_v42 = vsub.f32 %v1366_v30, %v1397_v43 }
 0x15e   :  { %3156 = vmatprep.subr.bf16.mxu1 %v4487_v1  ;;  %v1388_v17 = vand.u32 4294901760, %v1363_v47 }
 0x161   :  { %3158 = vmatpush3.bf16.msra.mxu1 %v3976_v33  ;;  %v1364_v33 = vld [vmem:[#allocation2 + $0x108] sm:$0xff] }
 0x162   :  { %3159 = vmatprep.subr.bf16.mxu1 %v4487_v1 }
 0x165   :  { %3161 = vmatpush3.bf16.msra.mxu1 %v3160_v3  ;;  %v1365_v3 = vld [vmem:[#allocation2 + $0x110] sm:$0xff] }
 0x166   :  { %3162 = vmatprep.subr.bf16.mxu1 %v4487_v1 }
 0x169   :  { %3164 = vmatpush3.bf16.msra.mxu1 %v3163_v19  ;;  %v1391_v19 = vand.u32 4294901760, %v1364_v33 }
 0x16a   :  { %3165 = vmatprep.subr.bf16.mxu1 %v4487_v1 }
 0x16b   :  { %v4062_v6 = vpack.c.bf16 %v1391_v19, %v1388_v17  ;;  %v4066_v9 = vsub.f32 %v1364_v33, %v1391_v19  ;;  %v1409_v33 = vand.u32 4294901760, %v1370_v32 }
 0x16d   :  { %3167 = vmatpush3.bf16.msra.mxu1 %v3166_v21  ;;  %v1394_v21 = vand.u32 4294901760, %v1365_v3  ;;  %3275 = vmatpush3.bf16.msra.mxu0 %v4062_v6  ;;  %v4086_v30 = vsub.f32 %v1370_v32, %v1409_v33 }
 0x16e   :  { %3168 = vmatprep.subr.bf16.mxu1 %v4487_v1  ;;  %3276 = vmatprep.subr.bf16.mxu0 %v4487_v1 }
 0x16f   :  { %v4068_v50 = vsub.f32 %v1365_v3, %v1394_v21  ;;  %v4070_v63 = vpack.c.bf16 %v1397_v43, %v1394_v21  ;;  %v1415_v3 = vand.u32 4294901760, %v1372_v10 }
 0x171   :  { %3170 = vmatpush3.bf16.msra.mxu1 %v3169_v27  ;;  %v1367_v27 = vld [vmem:[#allocation2 + $0x120] sm:$0xff]  ;;  %3278 = vmatpush3.bf16.msra.mxu0 %v4070_v63 }
 0x172   :  { %3171 = vmatprep.subr.bf16.mxu1 %v4487_v1  ;;  %3279 = vmatprep.subr.bf16.mxu0 %v4487_v1 }
 0x175   :  { %3173 = vmatpush3.bf16.msra.mxu1 %v3172_v4  ;;  %v1400_v4 = vand.u32 4294901760, %v1367_v27 }
 0x176   :  { %3174 = vmatprep.subr.bf16.mxu1 %v4487_v1 }
 0x177   :  { %v4074_v13 = vsub.f32 %v1367_v27, %v1400_v4  ;;  %v4090_v27 = vsub.f32 %v1372_v10, %v1415_v3 }
 0x179   :  { %3176 = vmatpush3.bf16.msra.mxu1 %v3175_v51  ;;  %v1403_v51 = vand.u32 4294901760, %v1368_v41 }
 0x17a   :  { %3177 = vmatprep.subr.bf16.mxu1 %v4487_v1 }
 0x17b   :  { %v4080_v12 = vsub.f32 %v1368_v41, %v1403_v51 }
 0x17c   :  { %2633 = vmatmul.mubr.f32.vlgmr.msra.gmra.mrb[2].mxu1 %v4037_v22 }
 0x17d   :  { %3179 = vmatpush3.bf16.msra.mxu1 %v3178_v55  ;;  %2667 = vmatprep.mubr.msk.f32.mxu1 %vm3508_vm0, %v4482_v14  ;;  %v4064_v55 = vsub.f32 %v1363_v47, %v1388_v17  ;;  %v1406_v47 = vand.u32 4294901760, %v1369_v28  ;;  %v1412_v17 = vand.u32 4294901760, %v1371_v5 }
 0x17e   :  { %3180 = vmatprep.subr.bf16.mxu1 %v4487_v1 }
 0x17f   :  { %v4084_v19 = vsub.f32 %v1369_v28, %v1406_v47  ;;  %v4088_v21 = vsub.f32 %v1371_v5, %v1412_v17  ;;  %v4104_v10 = vpack.c.bf16 %v1409_v33, %v1406_v47 }
 0x181   :  { %3182 = vmatpush3.bf16.msra.mxu1 %v3181_v11  ;;  %v4096_v11 = vpack.c.bf16 %v1403_v51, %v1400_v4 }
 0x182   :  { %3183 = vmatprep.subr.bf16.mxu1 %v4487_v1 }
 0x183   :  { %3281 = vmatpush3.bf16.msra.mxu0 %v4096_v11 }
 0x184   :  { %3282 = vmatprep.subr.bf16.mxu0 %v4487_v1 }
 0x185   :  { %3185 = vmatpush3.bf16.msra.mxu1 %v3184_v16  ;;  %v4112_v16 = vpack.c.bf16 %v1415_v3, %v1412_v17 }
 0x186   :  { %3186 = vmatprep.subr.bf16.mxu1 %v4487_v1 }
 0x187   :  { %3284 = vmatpush3.bf16.msra.mxu0 %v4104_v10 }
 0x188   :  { %3285 = vmatprep.subr.bf16.mxu0 %v4487_v1 }
 0x189   :  { %3188 = vmatpush3.bf16.msra.mxu1 %v3187_v62  ;;  %v3226_v62 = vpack.c.bf16 %v821_v20, %v814_v26  ;;  %v3232_v26 = vpack.c.bf16 %v4499_v59, %v4498_v39  ;;  %v4500_v20 = vand.u32 4294901760, %v4496_v31  ;;  %v4506_v31 = vand.u32 4294901760, %v3949_v48 }
 0x18a   :  { %3189 = vmatprep.subr.bf16.mxu1 %v4487_v1  ;;  %v1427_v48 = vand.u32 4294901760, %v1376_v52 }
 0x18b   :  { %3287 = vmatpush3.bf16.msra.mxu0 %v4112_v16  ;;  %v3235_v8 = vpack.c.bf16 %v4501_v54, %v4500_v20  ;;  %v1509_v20 = vand.u32 4294901760, %v4074_v13  ;;  %v1516_v54 = vand.u32 4294901760, %v4080_v12 }
 0x18c   :  { %3288 = vmatprep.subr.bf16.mxu0 %v4487_v1  ;;  %v4236_v5 = vsub.f32 %v1376_v52, %v1427_v48 }
 0x18d   :  { %3191 = vmatpush3.bf16.msra.mxu1 %v3190_v37  ;;  %v3229_v37 = vpack.c.bf16 %v835_v44, %v828_v24  ;;  %v4502_v24 = vand.u32 4294901760, %v3940_v38  ;;  %v4503_v44 = vand.u32 4294901760, %v3942_v15  ;;  %v4508_v38 = vand.u32 4294901760, %v3953_v0 }
 0x18e   :  { %3192 = vmatprep.subr.bf16.mxu1 %v4487_v1  ;;  %v4509_v15 = vand.u32 4294901760, %v3955_v61  ;;  %v1430_v0 = vand.u32 4294901760, %v1377_v34 }
 0x190   :  { %v4239_v47 = vsub.f32 %v1377_v34, %v1430_v0 }
 0x191   :  { %3194 = vmatpush3.bf16.msra.mxu1 %v3193_v60  ;;  %v3244_v60 = vpack.c.bf16 %v4507_v58, %v4506_v31  ;;  %v1523_v31 = vand.u32 4294901760, %v4084_v19  ;;  %v1530_v58 = vand.u32 4294901760, %v4086_v30 }
 0x192   :  { %3195 = vmatprep.subr.bf16.mxu1 %v4487_v1 }
 0x195   :  { %3197 = vmatpush3.bf16.msra.mxu1 %v3196_v18  ;;  %v3247_v18 = vpack.c.bf16 %v4509_v15, %v4508_v38  ;;  %v1524_v38 = vsub.f32 %v4084_v19, %v1523_v31  ;;  %v1531_v15 = vsub.f32 %v4086_v30, %v1530_v58 }
 0x196   :  { %3198 = vmatprep.subr.bf16.mxu1 %v4487_v1 }
 0x199   :  { %3200 = vmatpush3.bf16.msra.mxu1 %v3199_v23  ;;  %v1488_v23 = vand.u32 4294901760, %v4066_v9 }
 0x19a   :  { %3201 = vmatprep.subr.bf16.mxu1 %v4487_v1 }
 0x19b   :  { %v1489_v4 = vsub.f32 %v4066_v9, %v1488_v23 }
 0x19c   :  { %2668 = vmatmul.mubr.f32.vlgmr.msra.gmra.mrb[2].mxu1 %v4040_v35  ;;  %v3241_v35 = vpack.c.bf16 %v4505_v40, %v4504_v53 }
 0x19d   :  { %3203 = vmatpush3.bf16.msra.mxu1 %v3882_v36  ;;  %2702 = vmatprep.mubr.msk.f32.mxu1 %vm3508_vm0, %v4482_v14  ;;  %v1490_v3 = vand.u32 4294901760, %v1489_v4 }
 0x19e   :  { %3204 = vmatprep.subr.bf16.mxu1 %v4487_v1 }
 0x1a1   :  { %3206 = vmatpush3.bf16.msra.mxu1 %v3893_v49 }
 0x1a2   :  { %3207 = vmatprep.subr.bf16.mxu1 %v4487_v1 }
 0x1a5   :  { %3209 = vmatpush3.bf16.msra.mxu1 %v3905_v56 }
 0x1a6   :  { %3210 = vmatprep.subr.bf16.mxu1 %v4487_v1 }
 0x1a9   :  { %3212 = vmatpush3.bf16.msra.mxu1 %v3913_v2 }
 0x1aa   :  { %3213 = vmatprep.subr.bf16.mxu1 %v4487_v1 }
 0x1ad   :  { %3215 = vmatpush3.bf16.msra.mxu1 %v3918_v7 }
 0x1ae   :  { %3216 = vmatprep.subr.bf16.mxu1 %v4487_v1 }
 0x1b1   :  { %3218 = vmatpush3.bf16.msra.mxu1 %v3922_v25 }
 0x1b2   :  { %3219 = vmatprep.subr.bf16.mxu1 %v4487_v1 }
 0x1b5   :  { %3221 = vmatpush3.bf16.msra.mxu1 %v3926_v45 }
 0x1b6   :  { %3222 = vmatprep.subr.bf16.mxu1 %v4487_v1 }
 0x1b9   :  { %3224 = vmatpush3.bf16.msra.mxu1 %v3932_v57 }
 0x1ba   :  { %3225 = vmatprep.subr.bf16.mxu1 %v4487_v1 }
 0x1bc   :  { %2703 = vmatmul.mubr.f32.vlgmr.msra.gmra.mrb[2].mxu1 %v803_v46  ;;  %v3238_v46 = vpack.c.bf16 %v4503_v44, %v4502_v24  ;;  %v1510_v44 = vsub.f32 %v4074_v13, %v1509_v20 }
 0x1bd   :  { %3227 = vmatpush3.bf16.msra.mxu1 %v3226_v62  ;;  %2737 = vmatprep.mubr.msk.f32.mxu1 %vm3508_vm0, %v4482_v14  ;;  %v1495_v62 = vand.u32 4294901760, %v4068_v50 }
 0x1be   :  { %3228 = vmatprep.subr.bf16.mxu1 %v4487_v1  ;;  %v1511_v40 = vand.u32 4294901760, %v1510_v44 }
 0x1bf   :  { %v1496_v59 = vsub.f32 %v4068_v50, %v1495_v62 }
 0x1c1   :  { %3230 = vmatpush3.bf16.msra.mxu1 %v3229_v37  ;;  %v1502_v37 = vand.u32 4294901760, %v4072_v42 }
 0x1c2   :  { %3231 = vmatprep.subr.bf16.mxu1 %v4487_v1 }
 0x1c5   :  { %3233 = vmatpush3.bf16.msra.mxu1 %v3232_v26  ;;  %v1503_v26 = vsub.f32 %v4072_v42, %v1502_v37 }
 0x1c6   :  { %3234 = vmatprep.subr.bf16.mxu1 %v4487_v1 }
 0x1c7   :  { %v1504_v24 = vand.u32 4294901760, %v1503_v26 }
 0x1c9   :  { %3236 = vmatpush3.bf16.msra.mxu1 %v3235_v8  ;;  %v1497_v8 = vand.u32 4294901760, %v1496_v59  ;;  %v4477_v59 = vand.u32 4294901760, %v4236_v5 }
 0x1ca   :  { %3237 = vmatprep.subr.bf16.mxu1 %v4487_v1 }
 0x1cb   :  { %v3301_v53 = vpack.c.bf16 %v1504_v24, %v1497_v8  ;;  %v1573_v24 = vsub.f32 %v4236_v5, %v4477_v59 }
 0x1cd   :  { %3239 = vmatpush3.bf16.msra.mxu1 %v3238_v46  ;;  %v1517_v46 = vsub.f32 %v4080_v12, %v1516_v54 }
 0x1ce   :  { %3240 = vmatprep.subr.bf16.mxu1 %v4487_v1 }
 0x1d1   :  { %3242 = vmatpush3.bf16.msra.mxu1 %v3241_v35  ;;  %v1518_v35 = vand.u32 4294901760, %v1517_v46  ;;  %v1574_v46 = vand.u32 4294901760, %v1573_v24 }
 0x1d2   :  { %3243 = vmatprep.subr.bf16.mxu1 %v4487_v1 }
 0x1d5   :  { %3245 = vmatpush3.bf16.msra.mxu1 %v3244_v60  ;;  %v3304_v60 = vpack.c.bf16 %v1518_v35, %v1511_v40  ;;  %v4476_v40 = vand.u32 4294901760, %v4239_v47 }
 0x1d6   :  { %3246 = vmatprep.subr.bf16.mxu1 %v4487_v1 }
 0x1d9   :  { %3248 = vmatpush3.bf16.msra.mxu1 %v3247_v18  ;;  %v1525_v18 = vand.u32 4294901760, %v1524_v38 }
 0x1da   :  { %3249 = vmatprep.subr.bf16.mxu1 %v4487_v1 }
 0x1dc   :  { %2738 = vmatmul.mubr.f32.vlgmr.msra.gmra.mrb[2].mxu1 %v4037_v22 }
 0x1dd   :  { %3251 = vmatpush3.bf16.msra.mxu1 %v3882_v36  ;;  %2772 = vmatprep.mubr.msk.f32.mxu1 %vm3508_vm0, %v4482_v14  ;;  %v1373_v36 = vld [vmem:[#allocation2 + $0x150] sm:$0xff] }
 0x1de   :  { %3252 = vmatprep.subr.bf16.mxu1 %v4487_v1 }
 0x1e1   :  { %3254 = vmatpush3.bf16.msra.mxu1 %v3893_v49  ;;  %v1374_v49 = vld [vmem:[#allocation2 + $0x158] sm:$0xff] }
 0x1e2   :  { %3255 = vmatprep.subr.bf16.mxu1 %v4487_v1 }
 0x1e5   :  { %3257 = vmatpush3.bf16.msra.mxu1 %v3905_v56  ;;  %v1418_v56 = vand.u32 4294901760, %v1373_v36 }
 0x1e6   :  { %3258 = vmatprep.subr.bf16.mxu1 %v4487_v1 }
 0x1e7   :  { %v4230_v51 = vsub.f32 %v1373_v36, %v1418_v56  ;;  %v1532_v36 = vand.u32 4294901760, %v1531_v15  ;;  %v1580_v15 = vsub.f32 %v4239_v47, %v4476_v40 }
 0x1e9   :  { %3260 = vmatpush3.bf16.msra.mxu1 %v3913_v2  ;;  %v1421_v2 = vand.u32 4294901760, %v1374_v49  ;;  %v1551_v34 = vand.u32 4294901760, %v4230_v51 }
 0x1ea   :  { %3261 = vmatprep.subr.bf16.mxu1 %v4487_v1 }
 0x1eb   :  { %v4212_v29 = vpack.c.bf16 %v1421_v2, %v1418_v56  ;;  %v4232_v28 = vsub.f32 %v1374_v49, %v1421_v2  ;;  %v1537_v49 = vand.u32 4294901760, %v4088_v21  ;;  %v1544_v56 = vand.u32 4294901760, %v4090_v27 }
 0x1ec   :  { %v3307_v2 = vpack.c.bf16 %v1532_v36, %v1525_v18  ;;  %v1581_v36 = vand.u32 4294901760, %v1580_v15 }
 0x1ed   :  { %3263 = vmatpush3.bf16.msra.mxu1 %v3918_v7  ;;  %v1375_v7 = vld [vmem:[#allocation2 + $0x160] sm:$0xff]  ;;  %3290 = vmatpush3.bf16.msra.mxu0 %v4212_v29  ;;  %v1545_v52 = vsub.f32 %v4090_v27, %v1544_v56 }
 0x1ee   :  { %3264 = vmatprep.subr.bf16.mxu1 %v4487_v1  ;;  %3291 = vmatprep.subr.bf16.mxu0 %v4487_v1 }
 0x1f1   :  { %3266 = vmatpush3.bf16.msra.mxu1 %v3922_v25  ;;  %v1424_v25 = vand.u32 4294901760, %v1375_v7 }
 0x1f2   :  { %3267 = vmatprep.subr.bf16.mxu1 %v4487_v1 }
 0x1f3   :  { %v4234_v32 = vsub.f32 %v1375_v7, %v1424_v25  ;;  %v1538_v7 = vsub.f32 %v4088_v21, %v1537_v49 }
 0x1f5   :  { %3269 = vmatpush3.bf16.msra.mxu1 %v3926_v45  ;;  %v4216_v45 = vpack.c.bf16 %v1427_v48, %v1424_v25  ;;  %v1539_v25 = vand.u32 4294901760, %v1538_v7  ;;  %v1546_v48 = vand.u32 4294901760, %v1545_v52 }
 0x1f6   :  { %3270 = vmatprep.subr.bf16.mxu1 %v4487_v1 }
 0x1f7   :  { %3293 = vmatpush3.bf16.msra.mxu0 %v4216_v45 }
 0x1f8   :  { %3294 = vmatprep.subr.bf16.mxu0 %v4487_v1 }
 0x1f9   :  { %3272 = vmatpush3.bf16.msra.mxu1 %v3932_v57  ;;  %v1378_v57 = vld [vmem:[#allocation2 + $0x178] sm:$0xff] }
 0x1fa   :  { %v1433_v61 = vand.u32 4294901760, %v1378_v57 }
 0x1fc   :  { %2773 = vmatmul.mubr.f32.vlgmr.msra.gmra.mrb[2].mxu1 %v4037_v22  ;;  %v1481_v22 = vand.u32 4294901760, %v4064_v55  ;;  %v4222_v41 = vpack.c.bf16 %v1433_v61, %v1430_v0  ;;  %v4241_v33 = vsub.f32 %v1378_v57, %v1433_v61  ;;  %v1558_v57 = vand.u32 4294901760, %v4232_v28 }
 0x1fd   :  { %v3310_v0 = vpack.c.bf16 %v1546_v48, %v1539_v25  ;;  %v1552_v61 = vsub.f32 %v4230_v51, %v1551_v34  ;;  %v3322_v25 = vpack.c.bf16 %v4066_v9, %v4064_v55  ;;  %v3325_v48 = vpack.c.bf16 %v4072_v42, %v4068_v50 }
 0x1fe   :  { %v1482_v43 = vsub.f32 %v4064_v55, %v1481_v22  ;;  %3296 = vmatpush3.bf16.msra.mxu0 %v4222_v41  ;;  %v4475_v35 = vand.u32 4294901760, %v4241_v33  ;;  %v3343_v24 = vpack.c.bf16 %v4241_v33, %v4239_v47  ;;  %v3376_v55 = vpack.c.bf16 %v1516_v54, %v1509_v20 }
 0x1ff   :  { %3297 = vmatprep.subr.bf16.mxu0 %v4487_v1  ;;  %v1553_v4 = vand.u32 4294901760, %v1552_v61  ;;  %v3328_v61 = vpack.c.bf16 %v4080_v12, %v4074_v13  ;;  %v3379_v42 = vpack.c.bf16 %v1530_v58, %v1523_v31  ;;  %v3382_v9 = vpack.c.bf16 %v1544_v56, %v1537_v49 }
 0x200   :  { %v1483_v17 = vand.u32 4294901760, %v1482_v43  ;;  %v1559_v43 = vsub.f32 %v4232_v28, %v1558_v57  ;;  %v1587_v18 = vsub.f32 %v4241_v33, %v4475_v35  ;;  %v3385_v12 = vpack.c.bf16 %v1558_v57, %v1551_v34 }
 0x201   :  { %v4510_v13 = vand.u32 4294901760, %v4234_v32  ;;  %v4511_v50 = vand.u32 4294901760, %v4236_v5 }
 0x202   :  { %v4246_v39 = vpack.c.bf16 %v1490_v3, %v1483_v17  ;;  %v1560_v17 = vand.u32 4294901760, %v1559_v43  ;;  %v4478_v3 = vand.u32 4294901760, %v4234_v32  ;;  %v1588_v7 = vand.u32 4294901760, %v1587_v18 }
 0x203   :  { %v3331_v43 = vpack.c.bf16 %v4086_v30, %v4084_v19  ;;  %v3388_v19 = vpack.c.bf16 %v4511_v50, %v4510_v13  ;;  %v4512_v30 = vand.u32 4294901760, %v4239_v47 }
 0x204   :  { %v3313_v26 = vpack.c.bf16 %v1560_v17, %v1553_v4  ;;  %v1566_v8 = vsub.f32 %v4234_v32, %v4478_v3  ;;  %v3319_v52 = vpack.c.bf16 %v1588_v7, %v1581_v36  ;;  %v3334_v4 = vpack.c.bf16 %v4090_v27, %v4088_v21 }
 0x205   :  { %v3337_v17 = vpack.c.bf16 %v4232_v28, %v4230_v51  ;;  %v4513_v21 = vand.u32 4294901760, %v4241_v33 }
 0x206   :  { %v1567_v44 = vand.u32 4294901760, %v1566_v8  ;;  %v3340_v8 = vpack.c.bf16 %v4236_v5, %v4234_v32 }
 0x207   :  { %v3391_v27 = vpack.c.bf16 %v4513_v21, %v4512_v30 }
 0x208   :  { %v3316_v38 = vpack.c.bf16 %v1574_v46, %v1567_v44  ;;  %v2046_v44 = vld [vmem:[%s4442_s2 + $0x1] ss:$0 sm:$0xff] }
 0x2cf   :  { %v1357_v46 = vpop.f32.mrb[2].mxu1 }
 0x2d0   :  { %v3419_v15 = vadd.f32 %v2046_v44, %v1357_v46  ;;  %v2774_v18 = vpop.f32.mrb[3].mxu1 }
 0x2d2   :  { %v1361_v36 = vmax.f32 %v3419_v15, 0.0 }
 0x2d4   :  { %v4321_v7 = vand.u32 4294901760, %v1361_v36 }
 0x2d6   :  { %v1469_v35 = vsub.f32 %v1361_v36, %v4321_v7 }
 0x2d8   :  { %v1470_v40 = vand.u32 4294901760, %v1469_v35 }
 0x2da   :  { %v1471_v59 = vsub.f32 %v1469_v35, %v1470_v40 }
 0x2dc   :  { %v1472_v3 = vand.u32 4294901760, %v1471_v59 }
 0x2de   :  { %2808 = vmatmul.mubr.f32.vlgmr.msra.gmra.mrb[2].mxu0 %v1472_v3 }
 0x2df   :  { %3299 = vmatpush3.bf16.msra.mxu0 %v4246_v39  ;;  %2842 = vmatprep.mubr.msk.f32.mxu0 %vm3508_vm0, %v4482_v14  ;;  %v3370_v39 = vpack.c.bf16 %v1488_v23, %v1481_v22 }
 0x2e0   :  { %3300 = vmatprep.subr.bf16.mxu0 %v4487_v1 }
 0x2e3   :  { %3302 = vmatpush3.bf16.msra.mxu0 %v3301_v53  ;;  %v3373_v53 = vpack.c.bf16 %v1502_v37, %v1495_v62 }
 0x2e4   :  { %3303 = vmatprep.subr.bf16.mxu0 %v4487_v1 }
 0x2e7   :  { %3305 = vmatpush3.bf16.msra.mxu0 %v3304_v60 }
 0x2e8   :  { %3306 = vmatprep.subr.bf16.mxu0 %v4487_v1 }
 0x2eb   :  { %3308 = vmatpush3.bf16.msra.mxu0 %v3307_v2 }
 0x2ec   :  { %3309 = vmatprep.subr.bf16.mxu0 %v4487_v1 }
 0x2ef   :  { %3311 = vmatpush3.bf16.msra.mxu0 %v3310_v0 }
 0x2f0   :  { %3312 = vmatprep.subr.bf16.mxu0 %v4487_v1 }
 0x2f3   :  { %3314 = vmatpush3.bf16.msra.mxu0 %v3313_v26 }
 0x2f4   :  { %3315 = vmatprep.subr.bf16.mxu0 %v4487_v1 }
 0x2f7   :  { %3317 = vmatpush3.bf16.msra.mxu0 %v3316_v38 }
 0x2f8   :  { %3318 = vmatprep.subr.bf16.mxu0 %v4487_v1 }
 0x2fb   :  { %3320 = vmatpush3.bf16.msra.mxu0 %v3319_v52 }
 0x2fc   :  { %3321 = vmatprep.subr.bf16.mxu0 %v4487_v1 }
 0x2fe   :  { %2843 = vmatmul.mubr.f32.vlgmr.msra.gmra.mrb[2].mxu0 %v4321_v7 }
 0x2ff   :  { %3323 = vmatpush3.bf16.msra.mxu0 %v3322_v25  ;;  %2877 = vmatprep.mubr.msk.f32.mxu0 %vm3508_vm0, %v4482_v14 }
 0x300   :  { %3324 = vmatprep.subr.bf16.mxu0 %v4487_v1 }
 0x303   :  { %3326 = vmatpush3.bf16.msra.mxu0 %v3325_v48 }
 0x304   :  { %3327 = vmatprep.subr.bf16.mxu0 %v4487_v1 }
 0x307   :  { %3329 = vmatpush3.bf16.msra.mxu0 %v3328_v61 }
 0x308   :  { %3330 = vmatprep.subr.bf16.mxu0 %v4487_v1 }
 0x30b   :  { %3332 = vmatpush3.bf16.msra.mxu0 %v3331_v43 }
 0x30c   :  { %3333 = vmatprep.subr.bf16.mxu0 %v4487_v1 }
 0x30f   :  { %3335 = vmatpush3.bf16.msra.mxu0 %v3334_v4 }
 0x310   :  { %3336 = vmatprep.subr.bf16.mxu0 %v4487_v1 }
 0x313   :  { %3338 = vmatpush3.bf16.msra.mxu0 %v3337_v17 }
 0x314   :  { %3339 = vmatprep.subr.bf16.mxu0 %v4487_v1 }
 0x317   :  { %3341 = vmatpush3.bf16.msra.mxu0 %v3340_v8 }
 0x318   :  { %3342 = vmatprep.subr.bf16.mxu0 %v4487_v1 }
 0x31b   :  { %3344 = vmatpush3.bf16.msra.mxu0 %v3343_v24 }
 0x31c   :  { %3345 = vmatprep.subr.bf16.mxu0 %v4487_v1 }
 0x31e   :  { %2878 = vmatmul.mubr.f32.vlgmr.msra.gmra.mrb[2].mxu0 %v1469_v35 }
 0x31f   :  { %3347 = vmatpush3.bf16.msra.mxu0 %v4062_v6  ;;  %2912 = vmatprep.mubr.msk.f32.mxu0 %vm3508_vm0, %v4482_v14 }
 0x320   :  { %3348 = vmatprep.subr.bf16.mxu0 %v4487_v1 }
 0x323   :  { %3350 = vmatpush3.bf16.msra.mxu0 %v4070_v63 }
 0x324   :  { %3351 = vmatprep.subr.bf16.mxu0 %v4487_v1 }
 0x327   :  { %3353 = vmatpush3.bf16.msra.mxu0 %v4096_v11 }
 0x328   :  { %3354 = vmatprep.subr.bf16.mxu0 %v4487_v1 }
 0x32b   :  { %3356 = vmatpush3.bf16.msra.mxu0 %v4104_v10 }
 0x32c   :  { %3357 = vmatprep.subr.bf16.mxu0 %v4487_v1 }
 0x32f   :  { %3359 = vmatpush3.bf16.msra.mxu0 %v4112_v16 }
 0x330   :  { %3360 = vmatprep.subr.bf16.mxu0 %v4487_v1 }
 0x333   :  { %3362 = vmatpush3.bf16.msra.mxu0 %v4212_v29 }
 0x334   :  { %3363 = vmatprep.subr.bf16.mxu0 %v4487_v1 }
 0x337   :  { %3365 = vmatpush3.bf16.msra.mxu0 %v4216_v45 }
 0x338   :  { %3366 = vmatprep.subr.bf16.mxu0 %v4487_v1 }
 0x33b   :  { %3368 = vmatpush3.bf16.msra.mxu0 %v4222_v41 }
 0x33c   :  { %3369 = vmatprep.subr.bf16.mxu0 %v4487_v1 }
 0x33e   :  { %2913 = vmatmul.mubr.f32.vlgmr.msra.gmra.mrb[2].mxu0 %v1470_v40 }
 0x33f   :  { %3371 = vmatpush3.bf16.msra.mxu0 %v3370_v39  ;;  %2947 = vmatprep.mubr.msk.f32.mxu0 %vm3508_vm0, %v4482_v14 }
 0x340   :  { %3372 = vmatprep.subr.bf16.mxu0 %v4487_v1 }
 0x343   :  { %3374 = vmatpush3.bf16.msra.mxu0 %v3373_v53 }
 0x344   :  { %3375 = vmatprep.subr.bf16.mxu0 %v4487_v1 }
 0x347   :  { %3377 = vmatpush3.bf16.msra.mxu0 %v3376_v55 }
 0x348   :  { %3378 = vmatprep.subr.bf16.mxu0 %v4487_v1 }
 0x34b   :  { %3380 = vmatpush3.bf16.msra.mxu0 %v3379_v42 }
 0x34c   :  { %3381 = vmatprep.subr.bf16.mxu0 %v4487_v1 }
 0x34f   :  { %3383 = vmatpush3.bf16.msra.mxu0 %v3382_v9 }
 0x350   :  { %3384 = vmatprep.subr.bf16.mxu0 %v4487_v1 }
 0x353   :  { %3386 = vmatpush3.bf16.msra.mxu0 %v3385_v12 }
 0x354   :  { %3387 = vmatprep.subr.bf16.mxu0 %v4487_v1 }
 0x357   :  { %3389 = vmatpush3.bf16.msra.mxu0 %v3388_v19 }
 0x358   :  { %3390 = vmatprep.subr.bf16.mxu0 %v4487_v1 }
 0x35b   :  { %3392 = vmatpush3.bf16.msra.mxu0 %v3391_v27 }
 0x35c   :  { %3393 = vmatprep.subr.bf16.mxu0 %v4487_v1 }
 0x35e   :  { %2948 = vmatmul.mubr.f32.vlgmr.msra.gmra.mrb[2].mxu0 %v4321_v7 }
 0x35f   :  { %3395 = vmatpush3.bf16.msra.mxu0 %v4062_v6  ;;  %2982 = vmatprep.mubr.msk.f32.mxu0 %vm3508_vm0, %v4482_v14  ;;  %v2048_v14 = vld [vmem:[%s4442_s2 + $0x2] ss:$0 sm:$0xff] }
 0x360   :  { %3396 = vmatprep.subr.bf16.mxu0 %v4487_v1 }
 0x363   :  { %3398 = vmatpush3.bf16.msra.mxu0 %v4070_v63 }
 0x364   :  { %3399 = vmatprep.subr.bf16.mxu0 %v4487_v1 }
 0x367   :  { %3401 = vmatpush3.bf16.msra.mxu0 %v4096_v11 }
 0x368   :  { %3402 = vmatprep.subr.bf16.mxu0 %v4487_v1 }
 0x36b   :  { %3404 = vmatpush3.bf16.msra.mxu0 %v4104_v10 }
 0x36c   :  { %3405 = vmatprep.subr.bf16.mxu0 %v4487_v1 }
 0x36f   :  { %3407 = vmatpush3.bf16.msra.mxu0 %v4112_v16 }
 0x370   :  { %3408 = vmatprep.subr.bf16.mxu0 %v4487_v1 }
 0x373   :  { %3410 = vmatpush3.bf16.msra.mxu0 %v4212_v29 }
 0x374   :  { %3411 = vmatprep.subr.bf16.mxu0 %v4487_v1 }
 0x377   :  { %3413 = vmatpush3.bf16.msra.mxu0 %v4216_v45 }
 0x378   :  { %3414 = vmatprep.subr.bf16.mxu0 %v4487_v1 }
 0x37b   :  { %3416 = vmatpush3.bf16.msra.mxu0 %v4222_v41 }
 0x37e   :  { %2983 = vmatmul.mubr.f32.vlgmr.msra.gmra.mrb[2].mxu0 %v4321_v7 }
 0x451   :  { %v2024_v63 = vpop.f32.mrb[2].mxu0 }
 0x452   :  { %v3420_v6 = vadd.f32 %v2048_v14, %v2024_v63  ;;  %v2984_v11 = vpop.f32.mrb[3].mxu0 }
 0x454   :  { %2028 = vst [vmem:[#allocation5] sm:$0xff] %v3420_v6 }
 0x455   :  { %3489 = shalt.err (!%p3486_p12)
}
 0x456   :  { %s3490_s10 = scalar_lea.hbm %s4443_s3, 128 }
 0x457   :  { %p3491_p13 = scmp.ne.s32.totalorder %s4443_s3, %s3490_s10  ;;  %p3494_p0 = scmp.lt.u32.totalorder %s3490_s10, %s4443_s3 }
 0x459   :  { %p3496_p1 = pnand %p3494_p0, %p3491_p13 }
 0x45b   :  { %3499 = shalt.err (!%p3496_p1)
}
 0x45c   :  { %2038 = dma.vmem_to_hbm [thread:$0]  %s2036_s6, 128, %s4443_s3, [#allocation4]  }
 0x45d   :  { %3502 = dma.done.wait [#allocation4], 128  }
 0x45e   :  { %3503 = vsyncadd [#allocation4], 4294967168 }
 0x45f   :  { %2042 = vsyncpa [#allocation3], 1 }
 0x460   :  { %2043 = vsyncpa [#allocation4], 1 }

</bundles_post_ra>
